<compile_context>
chip_gen: v5e
topology: v5e:2x2
jax: 0.10.0
libtpu: 0.0.40
codegen_flags: <defaults>
</compile_context>

<pallas_src>
from functools import partial

import jax
import jax.numpy as jnp
from jax.experimental import pallas as pl
from jax.experimental.pallas import tpu as pltpu


# ------------------------------------------------------------------
# Threshold search on the per-channel BN weight vector (length C).
# Scalar parameter preprocessing, kept in plain JAX (torch.histc semantics).
# ------------------------------------------------------------------
def search_threshold(weight):
    nbins = weight.shape[0]
    bn_min = jnp.min(weight)
    bn_max = jnp.max(weight)
    width = (bn_max - bn_min) / nbins
    safe_width = jnp.where(width > 0, width, 1.0)  # guard all-equal weights
    # torch.histc: bin = floor((x - min)/width), value == max goes in last bin
    idxs = jnp.clip(
        jnp.floor((weight - bn_min) / safe_width).astype(jnp.int32), 0, nbins - 1
    )
    hist = jnp.zeros((nbins,), jnp.float32).at[idxs].add(1.0)
    d = jnp.diff(hist)
    cond = (d[:-1] <= 0) & (d[1:] > 0)            # diff[i] <= 0 < diff[i+1]
    idx = jnp.argmax(cond)                        # first True
    found = jnp.any(cond)
    thr = bn_min + (idx.astype(jnp.float32) + 2.0) * (bn_max - bn_min) / nbins
    # TODO(synk): PyTorch returns None when no such bin pattern exists (the
    # comparison would then raise); we fall back to bn_min (all channels pass).
    return jnp.where(found, thr, bn_min)


# ------------------------------------------------------------------
# Pallas kernel: channel-wise select between the two feature maps.
# Refs per grid step:
#   m1_ref, m2_ref : (tc, 1)  float32 {0.,1.} channel masks
#   x0_ref, x1_ref : (tc, tl) input tiles (N dim squeezed by BlockSpec)
#   o1_ref, o2_ref : (tc, tl) output tiles
# ------------------------------------------------------------------
def cmip_kernel(m1_ref, m2_ref, x0_ref, x1_ref, o1_ref, o2_ref):
    m1 = m1_ref[...] > 0.0          # (tc, 1) bool, broadcast across lanes
    m2 = m2_ref[...] > 0.0
    x0 = x0_ref[...]                # (tc, tl)
    x1 = x1_ref[...]
    o1_ref[...] = jnp.where(m1, x0, x1)
    o2_ref[...] = jnp.where(m2, x1, x0)


def _pick_tiles(C, L):
    """Pick (tc, tl) satisfying the (8,128) block constraint and VMEM budget."""
    # Channel (sublane) tile: multiple of 8, or full-extent if C is ragged.
    tc = min(C, 32) if (C % 8 == 0) else C
    # Lane tile: large multiple of 128 (lane-dense unmasked stores), or
    # full-extent if H*W is not 128-aligned (allowed: block == full dim).
    tl = min(L, 2048) if (L % 128 == 0) else L
    return tc, tl


@jax.jit
def cmip(x0, x1, bn1_weight, bn2_weight):
    """x0, x1: (N, C, H, W) float32.  bn*_weight: (C,) float32."""
    N, C, H, W = x0.shape
    L = H * W

    bn1 = jnp.abs(bn1_weight).astype(jnp.float32)
    bn2 = jnp.abs(bn2_weight).astype(jnp.float32)
    t1 = search_threshold(bn1)
    t2 = search_threshold(bn2)
    m1 = (bn1 >= t1).astype(jnp.float32).reshape(C, 1)
    m2 = (bn2 >= t2).astype(jnp.float32).reshape(C, 1)

    # Native layout, free reshape: (N, C, H, W) -> (N, C, H*W).
    x0k = x0.reshape(N, C, L)
    x1k = x1.reshape(N, C, L)

    tc, tl = _pick_tiles(C, L)
    grid = (N, pl.cdiv(C, tc), pl.cdiv(L, tl))

    x_spec = pl.BlockSpec((None, tc, tl), lambda n, ci, li: (n, ci, li))
    m_spec = pl.BlockSpec((tc, 1), lambda n, ci, li: (ci, 0))

    itemsize = jnp.dtype(x0.dtype).itemsize
    cost = pl.CostEstimate(
        flops=2 * N * C * L,
        transcendentals=0,
        bytes_accessed=4 * N * C * L * itemsize + 2 * C * 4,
    )

    out1, out2 = pl.pallas_call(
        cmip_kernel,
        grid=grid,
        out_shape=(
            jax.ShapeDtypeStruct((N, C, L), x0.dtype),
            jax.ShapeDtypeStruct((N, C, L), x0.dtype),
        ),
        in_specs=[m_spec, m_spec, x_spec, x_spec],
        out_specs=(x_spec, x_spec),
        input_output_aliases={2: 0, 3: 1},          # x0 -> out1, x1 -> out2
        cost_estimate=cost,
        compiler_params=pltpu.CompilerParams(
            dimension_semantics=("parallel", "parallel", "parallel"),
            vmem_limit_bytes=32 * 1024 * 1024,
        ),
    )(m1, m2, x0k, x1k)

    return out1.reshape(N, C, H, W), out2.reshape(N, C, H, W)


if __name__ == "__main__":
    N, C, H, W = 2, 8, 16, 16
    key = jax.random.PRNGKey(0)
    k0, k1 = jax.random.split(key)
    x0 = jax.random.normal(k0, (N, C, H, W), dtype=jnp.float32)
    x1 = jax.random.normal(k1, (N, C, H, W), dtype=jnp.float32)

    # Deterministic BN scale parameters (shape (C,), as in nn.BatchNorm2d.weight),
    # chosen so search_threshold's histogram pattern is guaranteed to exist.
    bn1_w = jnp.array([0.10, 0.12, 0.15, 0.50, 0.55, 0.90, 0.92, 0.95], jnp.float32)
    bn2_w = jnp.array([0.90, 0.10, 0.15, 0.60, 0.65, 0.20, 0.95, 0.50], jnp.float32)

    # Pure-JAX reference (computed before the kernel call).
    t1 = search_threshold(jnp.abs(bn1_w))
    t2 = search_threshold(jnp.abs(bn2_w))
    m1 = (jnp.abs(bn1_w) >= t1)[None, :, None, None]
    m2 = (jnp.abs(bn2_w) >= t2)[None, :, None, None]
    ref1 = jnp.where(m1, x0, x1)
    ref2 = jnp.where(m2, x1, x0)

    out1, out2 = cmip(x0, x1, bn1_w, bn2_w)
    jax.block_until_ready((out1, out2))

    assert out1.shape == (N, C, H, W) and out2.shape == (N, C, H, W)
    assert jnp.allclose(out1, ref1), "out1 mismatch"
    assert jnp.allclose(out2, ref2), "out2 mismatch"
    print("KERNEL_OK")
</pallas_src>

<mosaic_0001>
module attributes {stable_mosaic.version = 11 : i64} {
  func.func @cmip_kernel(%arg0: i32, %arg1: i32, %arg2: i32, %arg3: memref<8x1xf32, #tpu.memory_space<vmem>>, %arg4: memref<8x1xf32, #tpu.memory_space<vmem>>, %arg5: memref<1x8x256xf32, #tpu.memory_space<vmem>>, %arg6: memref<1x8x256xf32, #tpu.memory_space<vmem>>, %arg7: memref<1x8x256xf32, #tpu.memory_space<vmem>>, %arg8: memref<1x8x256xf32, #tpu.memory_space<vmem>>) attributes {dimension_semantics = [#tpu.dimension_semantics<parallel>, #tpu.dimension_semantics<parallel>, #tpu.dimension_semantics<parallel>], iteration_bounds = array<i64: 2, 1, 1>, scalar_prefetch = 0 : i64, scratch_operands = 0 : i64, tpu.core_type = #tpu.core_type<tc>, window_params = [{transform_indices = @transform_0, window_bounds = array<i64: 8, 1>}, {transform_indices = @transform_1, window_bounds = array<i64: 8, 1>}, {transform_indices = @transform_2, window_bounds = array<i64: 1, 8, 256>}, {transform_indices = @transform_3, window_bounds = array<i64: 1, 8, 256>}, {transform_indices = @transform_4, window_bounds = array<i64: 1, 8, 256>}, {transform_indices = @transform_5, window_bounds = array<i64: 1, 8, 256>}]} {
    %c0 = arith.constant 0 : index
    %c0_0 = arith.constant 0 : index
    %0 = vector.load %arg3[%c0, %c0_0] : memref<8x1xf32, #tpu.memory_space<vmem>>, vector<8x1xf32>
    %cst = arith.constant 0.000000e+00 : f32
    %1 = vector.broadcast %cst : f32 to vector<8x1xf32>
    %2 = arith.cmpf ogt, %0, %1 : vector<8x1xf32>
    %c0_1 = arith.constant 0 : index
    %c0_2 = arith.constant 0 : index
    %3 = vector.load %arg4[%c0_1, %c0_2] : memref<8x1xf32, #tpu.memory_space<vmem>>, vector<8x1xf32>
    %cst_3 = arith.constant 0.000000e+00 : f32
    %4 = vector.broadcast %cst_3 : f32 to vector<8x1xf32>
    %5 = arith.cmpf ogt, %3, %4 : vector<8x1xf32>
    %c0_4 = arith.constant 0 : index
    %c0_5 = arith.constant 0 : index
    %c0_6 = arith.constant 0 : index
    %6 = vector.load %arg5[%c0_4, %c0_5, %c0_6] : memref<1x8x256xf32, #tpu.memory_space<vmem>>, vector<1x8x256xf32>
    %7 = vector.shape_cast %6 : vector<1x8x256xf32> to vector<8x256xf32>
    %c0_7 = arith.constant 0 : index
    %c0_8 = arith.constant 0 : index
    %c0_9 = arith.constant 0 : index
    %8 = vector.load %arg6[%c0_7, %c0_8, %c0_9] : memref<1x8x256xf32, #tpu.memory_space<vmem>>, vector<1x8x256xf32>
    %9 = vector.shape_cast %8 : vector<1x8x256xf32> to vector<8x256xf32>
    %10 = vector.shape_cast %2 : vector<8x1xi1> to vector<8x1xi1>
    %11 = vector.broadcast %10 : vector<8x1xi1> to vector<8x256xi1>
    %12 = arith.select %11, %7, %9 : vector<8x256xi1>, vector<8x256xf32>
    %c0_10 = arith.constant 0 : index
    %c0_11 = arith.constant 0 : index
    %c0_12 = arith.constant 0 : index
    %13 = vector.load %arg7[%c0_10, %c0_11, %c0_12] : memref<1x8x256xf32, #tpu.memory_space<vmem>>, vector<1x8x256xf32>
    %14 = vector.shape_cast %13 : vector<1x8x256xf32> to vector<8x256xf32>
    %15 = vector.shape_cast %12 : vector<8x256xf32> to vector<1x8x256xf32>
    tpu.vector_store %arg7[%c0_10, %c0_11, %c0_12], %15 {strides = array<i32>} : memref<1x8x256xf32, #tpu.memory_space<vmem>>, vector<1x8x256xf32>,
    %16 = vector.shape_cast %5 : vector<8x1xi1> to vector<8x1xi1>
    %17 = vector.broadcast %16 : vector<8x1xi1> to vector<8x256xi1>
    %18 = arith.select %17, %9, %7 : vector<8x256xi1>, vector<8x256xf32>
    %c0_13 = arith.constant 0 : index
    %c0_14 = arith.constant 0 : index
    %c0_15 = arith.constant 0 : index
    %19 = vector.load %arg8[%c0_13, %c0_14, %c0_15] : memref<1x8x256xf32, #tpu.memory_space<vmem>>, vector<1x8x256xf32>
    %20 = vector.shape_cast %19 : vector<1x8x256xf32> to vector<8x256xf32>
    %21 = vector.shape_cast %18 : vector<8x256xf32> to vector<1x8x256xf32>
    tpu.vector_store %arg8[%c0_13, %c0_14, %c0_15], %21 {strides = array<i32>} : memref<1x8x256xf32, #tpu.memory_space<vmem>>, vector<1x8x256xf32>,
    return
  }
  func.func @transform_0(%arg0: i32, %arg1: i32, %arg2: i32) -> (i32, i32) {
    %c0_i32 = arith.constant 0 : i32
    %c0_i32_0 = arith.constant 0 : i32
    return %arg1, %c0_i32 : i32, i32
  }
  func.func @transform_1(%arg0: i32, %arg1: i32, %arg2: i32) -> (i32, i32) {
    %c0_i32 = arith.constant 0 : i32
    %c0_i32_0 = arith.constant 0 : i32
    return %arg1, %c0_i32 : i32, i32
  }
  func.func @transform_2(%arg0: i32, %arg1: i32, %arg2: i32) -> (i32, i32, i32) {
    %c0_i32 = arith.constant 0 : i32
    return %arg0, %arg1, %arg2 : i32, i32, i32
  }
  func.func @transform_3(%arg0: i32, %arg1: i32, %arg2: i32) -> (i32, i32, i32) {
    %c0_i32 = arith.constant 0 : i32
    return %arg0, %arg1, %arg2 : i32, i32, i32
  }
  func.func @transform_4(%arg0: i32, %arg1: i32, %arg2: i32) -> (i32, i32, i32) {
    %c0_i32 = arith.constant 0 : i32
    return %arg0, %arg1, %arg2 : i32, i32, i32
  }
  func.func @transform_5(%arg0: i32, %arg1: i32, %arg2: i32) -> (i32, i32, i32) {
    %c0_i32 = arith.constant 0 : i32
    return %arg0, %arg1, %arg2 : i32, i32, i32
  }
}

</mosaic_0001>

<bundles_post_ra>
// kernel: cmip.1
= control target key start
LH: loop header
LB: loop body
LE: loop exit
PB: predicated region body
PF: predicated region fallthrough
CT: control target
= control target key end

     0   :  { %s773_s18 = smov 0   ;;  %s775_s19 = smov 0   ;;  %s818_s0 = inlined_call_operand.vmem [shape: f32[8,1], index: 0, kind: input, shape index: {}]   ;;  %s819_s1 = inlined_call_operand.vmem [shape: f32[8,1], index: 1, kind: input, shape index: {}]   ;;  %s820_s2 = inlined_call_operand.vmem [shape: f32[2,8,256], index: 2, kind: input, shape index: {}, may-alias: {2,4}]   ;;  %s821_s3 = inlined_call_operand.vmem [shape: f32[2,8,256], index: 3, kind: input, shape index: {}, may-alias: {3,5}]   ;;  %s822_s4 = inlined_call_operand.vmem [shape: f32[2,8,256], index: 4, kind: output, shape index: {0}, may-alias: {2,4}]   ;;  %s823_s5 = inlined_call_operand.vmem [shape: f32[2,8,256], index: 5, kind: output, shape index: {1}, may-alias: {3,5}]  }
   0x1   :  { %s777_s20 = smov 0  }
   0x2 LB: > { %s35_s21 = sadd.s32 1, %s736_s19  ;;  %p677_p0 = scmp.ge.s32.totalorder %s740_s20, 1  ;;  %s740_s20 = sphi %s777_s20, %s16_s20   ;;  %s736_s19 = sphi %s775_s19, %s825_s19   ;;  %s732_s18 = sphi %s773_s18, %s824_s18  }
   0x3   : > { %p37_p1 = scmp.ge.s32.totalorder %s35_s21, 2  ;;  %p271_p2 = scmp.lt.s32.totalorder %s740_s20, 3 }
   0x5   : > { %s827_s21 = smov (%p37_p1, %s35_s21), 0  ;;  %p272_p3 = pnand %p677_p0, %p271_p2 }
   0x6   : > { %p358_p4 = scmp.lt.s32.totalorder (!%p272_p3), %s732_s18, 1 }
   0x7   : > { %275 = sbr.rel (%p272_p3) target bundleno = 142 (0x8e), region = 36 }
   0xc   : > { %v413_v0 = vld [vmem:[%s818_s0] sm:$0xff]  ;;  %v742_v1 = vmov 0   ;;  %s829_s18 = smov (!%p358_p4, %s732_s18), 1 }
   0xd   : > { %717 = vset.pattern.permute.xlu0 %v742_v1  ;;  %vm414_vm0 = vcmp.gt.f32.partialorder %v413_v0, 0.0  ;;  %v415_v3 = vld [vmem:[%s819_s1] sm:$0xff]  ;;  %s688_s26 = sshll.u32 %s829_s18, 4 }
   0xe   : > { %v421_v2 = vsel %vm414_vm0, 1, %v742_v1  ;;  %vm416_vm1 = vcmp.gt.f32.partialorder %v415_v3, 0.0  ;;  %s369_s29 = scalar_lea.vmem %s820_s2, %s688_s26  ;;  %s383_s7 = scalar_lea.vmem %s821_s3, %s688_s26 }
   0xf   : > { %423 = vperm.xlu0 %717, %v421_v2   ;;  %v430_v4 = vsel %vm416_vm1, 1, %v742_v1  ;;  %v417_v5 = vld [vmem:[%s369_s29] sm:$0xff]  ;;  %v418_v6 = vld [vmem:[%s369_s29 + $0x8] sm:$0xff]  ;;  %s397_s10 = scalar_lea.vmem %s822_s4, %s688_s26  ;;  %s411_s13 = scalar_lea.vmem %s823_s5, %s688_s26 }
  0x10   : > { %v419_v7 = vld [vmem:[%s383_s7] sm:$0xff]  ;;  %v420_v8 = vld [vmem:[%s383_s7 + $0x8] sm:$0xff] }
  0x17   : > { %432 = vperm.xlu0 %717, %v430_v4  }
  0x81   : > { %v424_v9 = vpop.permute.xlu0 %423 }
  0x82   : > { %vm425_vm2 = vcmp.eq.s32.totalorder %v424_v9, 1 }
  0x83   : > { %v426_v10 = vsel %vm425_vm2, %v417_v5, %v419_v7  ;;  %v427_v11 = vsel %vm425_vm2, %v418_v6, %v420_v8 }
  0x84   : > { %428 = vst [vmem:[%s397_s10] sm:$0xff] %v426_v10 }
  0x85   : > { %429 = vst [vmem:[%s397_s10 + $0x8] sm:$0xff] %v427_v11 }
  0x89   : > { %v433_v12 = vpop.permute.xlu0 %432 }
  0x8a   : > { %vm434_vm3 = vcmp.eq.s32.totalorder %v433_v12, 1 }
  0x8b   : > { %v435_v13 = vsel %vm434_vm3, %v419_v7, %v417_v5  ;;  %v436_v14 = vsel %vm434_vm3, %v420_v8, %v418_v6 }
  0x8c   : > { %437 = vst [vmem:[%s411_s13] sm:$0xff] %v435_v13 }
  0x8d   : > { %438 = vst [vmem:[%s411_s13 + $0x8] sm:$0xff] %v436_v14 }
  0x8e PF: > { %s16_s20 = sadd.s32 1, %s740_s20   ;;  %s824_s18 = smov %s736_s19 }
  0x8f   : > { %p13_p5 = scmp.ge.s32.totalorder %s16_s20, 4   ;;  %s825_s19 = smov %s827_s21 }
  0x91   :  { %15 = sbr.rel (!%p13_p5) target bundleno = 2 (0x2), region = 87 }

</bundles_post_ra>
